<compile_context>
chip_gen: v7x
topology: tpu7x:2x2x1
jax: 0.10.0
libtpu: 0.0.40
codegen_flags: <defaults>
</compile_context>

<pallas_src>
import functools

import jax
import jax.numpy as jnp
from jax.experimental import pallas as pl
from jax.experimental.pallas import tpu as pltpu


def _layernorm_kernel(x_ref, gamma_ref, beta_ref, o_ref, *, eps, n_valid):
    # x_ref: (row_tile, F_pad)   gamma_ref/beta_ref: (1, F_pad)
    x = x_ref[...].astype(jnp.float32)
    f_pad = x.shape[-1]
    masked = n_valid != f_pad  # static Python bool

    if masked:
        lane = jax.lax.broadcasted_iota(jnp.int32, x.shape, dimension=x.ndim - 1)
        valid = lane < n_valid
        x = jnp.where(valid, x, jnp.float32(0.0))

    # Stable two-pass statistics (free under the HBM roofline).
    mean = jnp.sum(x, axis=-1, keepdims=True) * jnp.float32(1.0 / n_valid)
    d = x - mean
    if masked:
        d = jnp.where(valid, d, jnp.float32(0.0))

    # torch.std default: unbiased (Bessel, N-1) estimator; eps added to std.
    var = jnp.sum(d * d, axis=-1, keepdims=True) * jnp.float32(1.0 / (n_valid - 1))
    std = jnp.sqrt(var)
    inv = pl.reciprocal(std + jnp.float32(eps))  # exact; (row_tile, 1) only

    gamma = gamma_ref[...].astype(jnp.float32)
    beta = beta_ref[...].astype(jnp.float32)

    y = d * inv * gamma + beta
    o_ref[...] = y.astype(o_ref.dtype)


def _round_up(x, m):
    return ((x + m - 1) // m) * m


def _vmem_capacity_bytes():
    """Physical VMEM per TensorCore, with a conservative fallback."""
    try:
        info = pltpu.get_tpu_info()
        for attr in ("vmem_capacity_bytes", "vmem_size_bytes"):
            v = getattr(info, attr, None)
            if v:
                return int(v)
    except Exception:
        pass
    return 64 << 20  # v7x physical VMEM (smallest of the three generations)


def _sublane(itemsize):
    # Sublane packing: 8 for 4-byte, 16 for 2-byte, 32 for 1-byte dtypes.
    return {4: 8, 2: 16, 1: 32}.get(itemsize, 8)


def _choose_row_tile(rows, f_pad, itemsize, tile_budget_bytes):
    sub = _sublane(itemsize)
    # Per row of tile (double-buffered in + out blocks, plus ~4 live f32
    # temporaries of width f_pad for the f32 compute path):
    per_row = f_pad * (4 * itemsize + 16)
    by_vmem = max(sub, tile_budget_bytes // max(per_row, 1))
    # Roofline saturates around 512-row / few-MiB blocks; cap input block ~2 MiB.
    by_bytes = max(sub, (2 << 20) // max(f_pad * itemsize, 1))
    # Target >= 16 grid steps total (>= 8 per TensorCore on v7x) when rows allow,
    # so prefetch/writeback of neighbouring blocks overlaps with compute.
    by_steps = max(sub, _round_up(pl.cdiv(rows, 16), sub))
    tile = min(by_vmem, by_bytes, by_steps, 1024)
    tile = max(sub, (tile // sub) * sub)

    # Prefer an even number of grid steps (balanced megacore split on v7x).
    steps = pl.cdiv(rows, tile)
    if steps > 1 and steps % 2 == 1:
        tile2 = max(sub, min(tile, _round_up(pl.cdiv(rows, steps + 1), sub)))
        if pl.cdiv(rows, tile2) % 2 == 0:
            tile = tile2
    return tile


def layer_norm(x, gamma, beta, *, eps=1e-7, row_tile=None):
    """LayerNorm over the last axis of x (any leading shape)."""
    features = x.shape[-1]
    assert features >= 2, "need at least 2 features for the unbiased std"
    assert gamma.shape == (features,) and beta.shape == (features,)

    lead_shape = x.shape[:-1]
    rows = 1
    for s in lead_shape:
        rows *= s
    x2 = x.reshape(rows, features)

    # Lane-dense layout: pad features to a multiple of 128; padded lanes are
    # masked out of the reductions inside the kernel (true n passed below).
    f_pad = _round_up(features, 128)
    if f_pad != features:
        x2 = jnp.pad(x2, ((0, 0), (0, f_pad - features)))
        gamma_p = jnp.pad(gamma, (0, f_pad - features))
        beta_p = jnp.pad(beta, (0, f_pad - features))
    else:
        gamma_p, beta_p = gamma, beta
    gamma2 = gamma_p.reshape(1, f_pad)
    beta2 = beta_p.reshape(1, f_pad)

    phys_vmem = _vmem_capacity_bytes()
    # 32 MiB scoped on v7x (64 MiB physical), 64 MiB on v5e/v6e (128 MiB).
    vmem_limit = int(min(phys_vmem // 2, 64 << 20))
    if row_tile is None:
        tile_budget = max(1 << 20, vmem_limit - (8 << 20))  # leave headroom
        row_tile = _choose_row_tile(rows, f_pad, x.dtype.itemsize, tile_budget)

    # Ragged trailing block is fine: rows are independent under LayerNorm and
    # out-of-bounds rows are never written back, so no pad/slice on the row
    # axis (which would cost an extra HBM pass on a mem-bound kernel).
    grid = (pl.cdiv(rows, row_tile),)

    kernel = functools.partial(_layernorm_kernel, eps=eps, n_valid=features)

    out = pl.pallas_call(
        kernel,
        out_shape=jax.ShapeDtypeStruct((rows, f_pad), x.dtype),
        grid_spec=pltpu.PrefetchScalarGridSpec(
            num_scalar_prefetch=0,
            grid=grid,
            in_specs=[
                pl.BlockSpec((row_tile, f_pad), lambda i: (i, 0)),
                pl.BlockSpec((1, f_pad), lambda i: (0, 0)),
                pl.BlockSpec((1, f_pad), lambda i: (0, 0)),
            ],
            out_specs=pl.BlockSpec((row_tile, f_pad), lambda i: (i, 0)),
        ),
        compiler_params=pltpu.CompilerParams(
            dimension_semantics=("parallel",),
            vmem_limit_bytes=vmem_limit,
        ),
    )(x2, gamma2, beta2)

    if f_pad != features:
        out = out[:, :features]
    return out.reshape(*lead_shape, features)


if __name__ == "__main__":
    key = jax.random.PRNGKey(0)

    batch, seq, hidden = 2, 8, 32
    x = jax.random.normal(key, (batch, seq, hidden), dtype=jnp.float32)

    # Matches nn.Parameter(torch.ones(features)) / torch.zeros(features).
    gamma = jnp.ones((hidden,), dtype=jnp.float32)
    beta = jnp.zeros((hidden,), dtype=jnp.float32)

    out = layer_norm(x, gamma, beta, eps=1e-7)
    out = jax.block_until_ready(out)

    # Reference in plain JAX (unbiased std, eps on std) — sanity only.
    mean = jnp.mean(x, axis=-1, keepdims=True)
    std = jnp.sqrt(jnp.sum((x - mean) ** 2, axis=-1, keepdims=True) / (hidden - 1))
    ref = gamma * (x - mean) / (std + 1e-7) + beta
    assert jnp.max(jnp.abs(out - ref)) < 1e-5, "mismatch vs reference"

    print("KERNEL_OK")
</pallas_src>

<mosaic_0001>
module attributes {stable_mosaic.version = 11 : i64} {
  func.func @_layernorm_kernel(%arg0: i32, %arg1: memref<8x128xf32, #tpu.memory_space<vmem>>, %arg2: memref<1x128xf32, #tpu.memory_space<vmem>>, %arg3: memref<1x128xf32, #tpu.memory_space<vmem>>, %arg4: memref<8x128xf32, #tpu.memory_space<vmem>>) attributes {dimension_semantics = [#tpu.dimension_semantics<parallel>], iteration_bounds = array<i64: 2>, scalar_prefetch = 0 : i64, scratch_operands = 0 : i64, tpu.core_type = #tpu.core_type<tc>, window_params = [{transform_indices = @transform_0, window_bounds = array<i64: 8, 128>}, {pipeline_mode = #tpu.pipeline_mode<synchronous>, transform_indices = @transform_1, window_bounds = array<i64: 1, 128>}, {pipeline_mode = #tpu.pipeline_mode<synchronous>, transform_indices = @transform_2, window_bounds = array<i64: 1, 128>}, {transform_indices = @transform_3, window_bounds = array<i64: 8, 128>}]} {
    %c0 = arith.constant 0 : index
    %c0_0 = arith.constant 0 : index
    %0 = vector.load %arg1[%c0, %c0_0] : memref<8x128xf32, #tpu.memory_space<vmem>>, vector<8x128xf32>
    %1 = tpu.iota {dimensions = array<i32: 1>} : vector<8x128xi32>
    %c32_i32 = arith.constant 32 : i32
    %2 = vector.broadcast %c32_i32 : i32 to vector<8x128xi32>
    %3 = arith.cmpi slt, %1, %2 : vector<8x128xi32>
    %cst = arith.constant 0.000000e+00 : f32
    %4 = vector.broadcast %cst : f32 to vector<8x128xf32>
    %5 = arith.select %3, %0, %4 : vector<8x128xi1>, vector<8x128xf32>
    %cst_1 = arith.constant dense<0.000000e+00> : vector<8xf32>
    %6 = vector.multi_reduction <add>, %5, %cst_1 [1] : vector<8x128xf32> to vector<8xf32>
    %7 = vector.shape_cast %6 : vector<8xf32> to vector<8x1xf32>
    %cst_2 = arith.constant 3.125000e-02 : f32
    %8 = vector.broadcast %cst_2 : f32 to vector<8x1xf32>
    %9 = arith.mulf %7, %8 : vector<8x1xf32>
    %10 = vector.broadcast %9 : vector<8x1xf32> to vector<8x128xf32>
    %11 = arith.subf %5, %10 : vector<8x128xf32>
    %cst_3 = arith.constant 0.000000e+00 : f32
    %12 = vector.broadcast %cst_3 : f32 to vector<8x128xf32>
    %13 = arith.select %3, %11, %12 : vector<8x128xi1>, vector<8x128xf32>
    %14 = arith.mulf %13, %13 : vector<8x128xf32>
    %cst_4 = arith.constant dense<0.000000e+00> : vector<8xf32>
    %15 = vector.multi_reduction <add>, %14, %cst_4 [1] : vector<8x128xf32> to vector<8xf32>
    %16 = vector.shape_cast %15 : vector<8xf32> to vector<8x1xf32>
    %cst_5 = arith.constant 0.0322580636 : f32
    %17 = vector.broadcast %cst_5 : f32 to vector<8x1xf32>
    %18 = arith.mulf %16, %17 : vector<8x1xf32>
    %19 = math.sqrt %18 : vector<8x1xf32>
    %cst_6 = arith.constant 1.000000e-07 : f32
    %20 = vector.broadcast %cst_6 : f32 to vector<8x1xf32>
    %21 = arith.addf %19, %20 : vector<8x1xf32>
    %22 = tpu.reciprocal %21 : vector<8x1xf32> -> vector<8x1xf32>
    %c0_7 = arith.constant 0 : index
    %c0_8 = arith.constant 0 : index
    %23 = vector.load %arg2[%c0_7, %c0_8] : memref<1x128xf32, #tpu.memory_space<vmem>>, vector<1x128xf32>
    %c0_9 = arith.constant 0 : index
    %c0_10 = arith.constant 0 : index
    %24 = vector.load %arg3[%c0_9, %c0_10] : memref<1x128xf32, #tpu.memory_space<vmem>>, vector<1x128xf32>
    %25 = vector.broadcast %22 : vector<8x1xf32> to vector<8x128xf32>
    %26 = arith.mulf %13, %25 : vector<8x128xf32>
    %27 = vector.broadcast %23 : vector<1x128xf32> to vector<8x128xf32>
    %28 = arith.mulf %26, %27 : vector<8x128xf32>
    %29 = vector.broadcast %24 : vector<1x128xf32> to vector<8x128xf32>
    %30 = arith.addf %28, %29 : vector<8x128xf32>
    %c0_11 = arith.constant 0 : index
    %c0_12 = arith.constant 0 : index
    %31 = vector.load %arg4[%c0_11, %c0_12] : memref<8x128xf32, #tpu.memory_space<vmem>>, vector<8x128xf32>
    tpu.vector_store %arg4[%c0_11, %c0_12], %30 {strides = array<i32>} : memref<8x128xf32, #tpu.memory_space<vmem>>, vector<8x128xf32>,
    return
  }
  func.func @transform_0(%arg0: i32) -> (i32, i32) {
    %c0_i32 = arith.constant 0 : i32
    %c0_i32_0 = arith.constant 0 : i32
    return %arg0, %c0_i32 : i32, i32
  }
  func.func @transform_1(%arg0: i32) -> (i32, i32) {
    %c0_i32 = arith.constant 0 : i32
    %c0_i32_0 = arith.constant 0 : i32
    %c0_i32_1 = arith.constant 0 : i32
    return %c0_i32, %c0_i32_0 : i32, i32
  }
  func.func @transform_2(%arg0: i32) -> (i32, i32) {
    %c0_i32 = arith.constant 0 : i32
    %c0_i32_0 = arith.constant 0 : i32
    %c0_i32_1 = arith.constant 0 : i32
    return %c0_i32, %c0_i32_0 : i32, i32
  }
  func.func @transform_3(%arg0: i32) -> (i32, i32) {
    %c0_i32 = arith.constant 0 : i32
    %c0_i32_0 = arith.constant 0 : i32
    return %arg0, %c0_i32 : i32, i32
  }
}

</mosaic_0001>

<bundles_post_ra>
// kernel: tpu_custom_call.1
= control target key start
LH: loop header
LB: loop body
LE: loop exit
PB: predicated region body
PF: predicated region fallthrough
CT: control target
= control target key end

     0   :  { %8 = vsyncpa [#allocation3], 0  ;;  %s666_s0 = inlined_call_operand.hbm [shape: f32[16,128], index: 0, kind: input, shape index: {}]   ;;  %s667_s1 = inlined_call_operand.vmem [shape: f32[1,128], index: 1, kind: input, shape index: {}]   ;;  %s668_s2 = inlined_call_operand.vmem [shape: f32[1,128], index: 2, kind: input, shape index: {}]   ;;  %s669_s3 = inlined_call_operand.hbm [shape: f32[16,128], index: 3, kind: output, shape index: {}]  }
   0x1   :  { %10 = vsyncpa [#allocation3 + $0x1], 0 }
   0x2   :  { %11 = vsyncpa [#allocation4], 0 }
   0x3   :  { %13 = vsyncpa [#allocation4 + $0x1], 0  ;;  %s495_s12 = smov 0   ;;  %s497_s13 = smov 0  }
   0x4   :  { %s499_s14 = smov 0   ;;  %s501_s15 = smov 0  }
   0x5 LB: > { %s516_s16 = sadd.s32 4294967295, %s471_s15   ;;  %s311_s17 = sadd.s32 4294967294, %s471_s15   ;;  %s471_s15 = sphi %s501_s15, %s684_s15   ;;  %s467_s14 = sphi %s499_s14, %s683_s14   ;;  %s463_s13 = sphi %s497_s13, %s682_s13   ;;  %s459_s12 = sphi %s495_s12, %s681_s12  }
   0x6   : > { %s520_s18 = sadd.s32 1, %s471_s15   ;;  %s26_s19 = sadd.s32 1, %s467_s14 }
   0x7   : > { %s23_s20 = ssub.s32 %s471_s15, %s520_s18  ;;  %p33_p0 = scmp.ne.s32.totalorder %s467_s14, %s463_s13 }
   0x8   : > { %p24_p1 = scmp.eq.s32.totalorder %s23_s20, 0  ;;  %p34_p2 = scmp.eq.s32.totalorder %s471_s15, 0 }
   0x9   : > { %p39_p3 = scmp.ne.s32.totalorder %s463_s13, %s459_s12  ;;  %p40_p4 = scmp.eq.s32.totalorder %s516_s16, 0 }
   0xa   : > { %s532_s21 = scalar_select %p24_p1, %s467_s14, %s26_s19  }
   0xb   : > { %p534_p5 = por %p34_p2, %p33_p0  ;;  %p538_p6 = por %p40_p4, %p39_p3 }
   0xc   : > { %p105_p7 = scmp.eq.s32.totalorder %s516_s16, 1  ;;  %p111_p8 = scmp.eq.s32.totalorder %s311_s17, 1 }
   0xd   : > { %p337_p10 = scmp.lt.s32.totalorder %s471_s15, 2  ;;  %s137_s26 = sand.u32 1, %s467_s14  }
   0xe   : > { %p545_p11 = por %p105_p7, %p33_p0  ;;  %p549_p12 = por %p111_p8, %p39_p3 }
   0xf   : > { %s315_s27 = sshll.u32 %s471_s15, 7  ;;  %s314_s28 = sshll.u32 %s137_s26, 3 }
  0x10   : > { %s673_s24 = scalar_select %p545_p11, 1, 0 }
  0x11   : > { %s674_s25 = scalar_select %p549_p12, 1, 0 }
  0x12   : > { %s558_s4 = scalar_lea.hbm %s666_s0, %s315_s27  ;;  %s141_s5 = scalar_lea.vmem [#allocation2], %s314_s28 }
  0x13   : > { %s148_s6 = sshll.u32 %s141_s5, 4  ;;  %p562_p13 = pnand %p337_p10, %p534_p5  ;;  %s566_s6 = int_to_ptr.vmem [resolvable:$true] %s148_s6 }
  0x14   : > { %s138_s8 = scalar_lea.sflag [#allocation3], %s137_s26  ;;  %s375_s9 = scalar_lea.hbm %s558_s4, 128 }
  0x15   : > { %p376_p2 = scmp.ne.s32.totalorder %s558_s4, %s375_s9  ;;  %p377_p3 = pneg %p562_p13 }
  0x16   : > { %s380_s17 = scalar_lea.hbm %s666_s0, 256  ;;  %p381_p5 = scmp.lt.u32.totalorder %s558_s4, %s666_s0 }
  0x17   : > { %p378_p4 = pnand %p377_p3, %p376_p2  ;;  %p382_p8 = scmp.lt.u32.totalorder %s380_s17, %s375_s9 }
  0x18   : > { %p384_p9 = scmp.lt.u32.totalorder %s375_s9, %s558_s4 }
  0x19   : > { %p379_p7 = pneg %p378_p4  ;;  %p383_p10 = por %p382_p8, %p381_p5 }
  0x1b   : > { %p385_p0 = por %p384_p9, %p383_p10 }
  0x1d   : > { %p386_p1 = pnand %p385_p0, %p379_p7 }
  0x1f   : > { %389 = shalt.err (!%p386_p1)
}
  0x20   : > { %s390_s22 = scalar_lea.vmem %s566_s6, 128  ;;  %s473_s26 = smov [#allocation2]  }
  0x21   : > { %p391_p2 = scmp.ne.s32.totalorder %s566_s6, %s390_s22  ;;  %s395_s27 = sshll.u32 %s473_s26, 4  ;;  %s396_s27 = int_to_ptr.vmem [resolvable:$false] %s395_s27 }
  0x22   : > { %s397_s28 = scalar_lea.vmem %s396_s27, 256  ;;  %p398_p11 = scmp.lt.s32.totalorder %s566_s6, %s396_s27 }
  0x23   : > { %p393_p4 = pnand %p391_p2, %p377_p3  ;;  %p399_p5 = scmp.lt.s32.totalorder %s397_s28, %s390_s22 }
  0x25   : > { %p394_p12 = pneg %p393_p4  ;;  %p400_p8 = por %p399_p5, %p398_p11 }
  0x27   : > { %p401_p9 = pnand %p400_p8, %p394_p12 }
  0x29   : > { %404 = shalt.err (!%p401_p9)
}
  0x2a   : > { %332 = dma.hbm_to_vmem [thread:$0]  (!%p562_p13), %s558_s4, 128, %s566_s6, %s138_s8  }
  0x2b   : > { %p676_p0 = scmp.lt.s32.totalorder %s471_s15, 3  ;;  %p677_p1 = scmp.ge.s32.totalorder %s471_s15, 1 }
  0x2d   : > { %p154_p3 = pnand %p677_p1, %p676_p0 }
  0x2e   : > { %s600_s29 = sand.u32 (!%p154_p3), 1, %s463_s13  }
  0x2f   : > { %157 = sbr.rel (%p154_p3) target bundleno = 402 (0x192), region = 32  ;;  %s317_s30 = sshll.u32 (!%p154_p3), %s600_s29, 3 }
  0x30   : > { %s160_s5 = scalar_lea.sflag (!%p154_p3), [#allocation3], %s600_s29  ;;  %s163_s7 = scalar_lea.vmem (!%p154_p3), [#allocation2], %s317_s30 }
  0x36   : > { %450 = dma.done.wait (%p538_p6), %s160_s5, 128  }
  0x37   : > { %452 = vsyncadd (%p538_p6), %s160_s5, 4294967168  ;;  %v187_v0 = vlaneseq  ;;  %v186_v2 = vld [vmem:[%s163_s7] sm:$0xff]  ;;  %s322_s9 = sshll.u32 %s516_s16, 7  ;;  %s185_s10 = scalar_lea.vmem [#allocation5], %s317_s30 }
  0x38   : > { %v319_v18 = vld [vmem:[%s667_s1] ss:$0 sm:$0xff]  ;;  %s241_s11 = sshll.u32 %s185_s10, 4  ;;  %s622_s20 = scalar_lea.hbm %s669_s3, %s322_s9  ;;  %s624_s11 = int_to_ptr.vmem [resolvable:$true] %s241_s11 }
  0x39   : > { %v188_v1 = vand.u32 127, %v187_v0  ;;  %v320_v20 = vld [vmem:[%s668_s2] ss:$0 sm:$0xff]  ;;  %s228_s22 = scalar_lea.sflag [#allocation4], %s600_s29  ;;  %s405_s26 = scalar_lea.vmem %s624_s11, 128 }
  0x3a   : > { %p406_p6 = scmp.ne.s32.totalorder %s624_s11, %s405_s26  ;;  %p678_p11 = scmp.ne.s32.totalorder %s673_s24, 0 }
  0x3b   : > { %vm189_vm0 = vcmp.lt.s32.totalorder %v188_v1, 32  ;;  %s474_s16 = smov [#allocation5]  }
  0x3c   : > { %v190_v3 = vsel %vm189_vm0, %v186_v2, 0.0  ;;  %p407_p12 = pnand %p406_p6, %p678_p11  ;;  %s409_s27 = sshll.u32 %s474_s16, 4  ;;  %s410_s27 = int_to_ptr.vmem [resolvable:$false] %s409_s27 }
  0x3d   : > { %191 = vadd.xlane.f32.xlu0 %v190_v3  ;;  %s411_s28 = scalar_lea.vmem %s410_s27, 256  ;;  %p412_p7 = scmp.lt.s32.totalorder %s624_s11, %s410_s27 }
  0x3e   : > { %p408_p13 = pneg %p407_p12  ;;  %p413_p10 = scmp.lt.s32.totalorder %s411_s28, %s405_s26 }
  0x40   : > { %p414_p2 = por %p413_p10, %p412_p7 }
  0x42   : > { %p415_p4 = pnand %p414_p2, %p408_p13 }
  0xca   : > { %v192_v4 = vpop.xlane.xlu0 %191 }
  0xcb   : > { %v193_v5 = vmul.f32 0.03125, %v192_v4 }
  0xcd   : > { %v194_v6 = vsub.f32 %v190_v3, %v193_v5 }
  0xcf   : > { %v195_v7 = vsel %vm189_vm0, %v194_v6, 0.0 }
  0xd0   : > { %v196_v8 = vmul.f32 %v195_v7, %v195_v7 }
  0xd2   : > { %197 = vadd.xlane.f32.xlu0 %v196_v8 }
 0x15f   : > { %v198_v9 = vpop.xlane.xlu0 %197 }
 0x160   : > { %v199_v10 = vmul.f32 0.032258064, %v198_v9 }
 0x162   : > { %371 = vrsqrt.f32 %v199_v10  ;;  %vm202_vm1 = vcmp.eq.f32.partialorder %v199_v10, inf  ;;  %v205_v13 = vand.u32 2147483648, %v199_v10  ;;  %vm204_vm2 = vcmp.eq.f32.partialorder %v199_v10, 0.0 }
 0x16c   : > { %v372_v11 = vpop.eup %371 }
 0x16d   : > { %v201_v12 = vmul.f32 %v372_v11, %v199_v10 }
 0x16f   : > { %v203_v14 = vsel %vm202_vm1, %v199_v10, %v201_v12 }
 0x170   : > { %v206_v15 = vsel %vm204_vm2, %v205_v13, %v203_v14 }
 0x171   : > { %v207_v16 = vadd.f32 1e-07, %v206_v15 }
 0x173   : > { %373 = vrcp.f32 %v207_v16 }
 0x17d   : > { %v374_v17 = vpop.eup %373 }
 0x17e   : > { %v211_v19 = vmul.f32 %v374_v17, %v195_v7 }
 0x180   : > { %v218_v21 = vmul.f32 %v319_v18, %v211_v19 }
 0x182   : > { %v225_v22 = vadd.f32 %v320_v20, %v218_v21 }
 0x184   : > { %226 = vst [vmem:[%s185_s10] sm:$0xff] %v225_v22 }
 0x185   : > { %418 = shalt.err (!%p415_p4)
}
 0x186   : > { %s419_s29 = scalar_lea.hbm %s622_s20, 128  ;;  %s423_s7 = scalar_lea.hbm %s669_s3, 256 }
 0x187   : > { %p420_p5 = scmp.ne.s32.totalorder %s622_s20, %s419_s29  ;;  %p424_p0 = scmp.lt.u32.totalorder %s622_s20, %s669_s3 }
 0x188   : > { %p425_p1 = scmp.lt.u32.totalorder %s423_s7, %s419_s29  ;;  %p427_p6 = scmp.lt.u32.totalorder %s419_s29, %s622_s20 }
 0x189   : > { %p421_p8 = pnand %p420_p5, %p678_p11 }
 0x18a   : > { %p426_p3 = por %p425_p1, %p424_p0 }
 0x18b   : > { %p422_p9 = pneg %p421_p8 }
 0x18c   : > { %p428_p12 = por %p427_p6, %p426_p3 }
 0x18e   : > { %p429_p13 = pnand %p428_p12, %p422_p9 }
 0x190   : > { %432 = shalt.err (!%p429_p13)
}
 0x191   : > { %327 = dma.vmem_to_hbm [thread:$0]  (%p678_p11), %s624_s11, 128, %s622_s20, %s228_s22  }
 0x192 PF: > { %s253_s6 = sand.u32 1, %s459_s12   ;;  %p679_p7 = scmp.ne.s32.totalorder %s674_s25, 0 }
 0x193   : > { %p680_p10 = scmp.ge.s32.totalorder %s471_s15, 2  ;;  %s254_s8 = scalar_lea.sflag [#allocation4], %s253_s6 }
 0x195   : > { %p334_p2 = pnand %p680_p10, %p679_p7 }
 0x197   : > { %454 = dma.done.wait (!%p334_p2), %s254_s8, 128  }
 0x198   : > { %456 = vsyncadd (!%p334_p2), %s254_s8, 4294967168  ;;  %p16_p4 = scmp.ge.s32.totalorder %s520_s18, 4   ;;  %s681_s12 = smov %s463_s13 }
 0x199   : > { %s682_s13 = smov %s467_s14  ;;  %s683_s14 = smov %s532_s21 }
 0x19a   : > { %s684_s15 = smov %s520_s18  ;;  %18 = sbr.rel (!%p16_p4) target bundleno = 5 (0x5), region = 77 }
 0x1a1   :  { %259 = vsyncpa [#allocation3], 1 }
 0x1a2   :  { %261 = vsyncpa [#allocation3 + $0x1], 1 }
 0x1a3   :  { %262 = vsyncpa [#allocation4], 1 }
 0x1a4   :  { %264 = vsyncpa [#allocation4 + $0x1], 1 }

</bundles_post_ra>
